<compile_context>
chip_gen: v7x
topology: tpu7x:2x2x1
jax: 0.10.0
libtpu: 0.0.40
codegen_flags: <defaults>
</compile_context>

<pallas_src>
import functools
import math

import jax
import jax.numpy as jnp
from jax.experimental import pallas as pl
from jax.experimental.pallas import tpu as pltpu


def _msa_kernel(x_ref, w_ref, b_ref, o_ref, kv_ref, *, n_heads, d_head, tq):
    # x_ref:  (1, N, d)   full sequence of the current batch (re-DMAed on new b)
    # w_ref:  (d, 3*d)    fused block-diagonal [Wq*scale | Wk | Wv], VMEM-resident
    # b_ref:  (1, 3*d)    fused [bq*scale | bk | bv], f32
    # o_ref:  (1, tq, d)  output tile (lane-dense last dim = d)
    # kv_ref: (N, 2*d)    VMEM scratch holding K|V for the current batch
    qi = pl.program_id(1)
    d = n_heads * d_head
    cdt = w_ref.dtype                       # MXU operand dtype (f32 or bf16)

    # ---- K/V projection for the whole sequence, once per batch element. ----
    @pl.when(qi == 0)
    def _():
        xf = x_ref[0]                                                # (N, d)
        kv = jnp.dot(xf, w_ref[:, d:3 * d],
                     preferred_element_type=jnp.float32) + b_ref[:, d:3 * d]
        kv_ref[...] = kv.astype(cdt)                                 # (N, 2d)

    # ---- Q projection for this query tile (scale folded into Wq/bq). ----
    row0 = pl.multiple_of(qi * tq, tq)
    xq = x_ref[0, pl.ds(row0, tq), :]                                # (tq, d)
    q = (jnp.dot(xq, w_ref[:, 0:d], preferred_element_type=jnp.float32)
         + b_ref[:, 0:d]).astype(cdt)                                # (tq, d)

    # Small static head count -> unrolled.
    # TODO(synk): for large n_heads use lax.fori_loop with pl.ds head slices
    # (or a head grid axis) so only one head's intermediates stay live.
    for h in range(n_heads):
        sl = slice(h * d_head, (h + 1) * d_head)
        k_h = kv_ref[:, sl]                                          # (N, d_head)
        v_h = kv_ref[:, d + h * d_head:d + (h + 1) * d_head]         # (N, d_head)

        # (tq, N) scores: contract last dims directly (no explicit k.T).
        s = jax.lax.dot_general(
            q[:, sl], k_h,
            dimension_numbers=(((1,), (1,)), ((), ())),
            preferred_element_type=jnp.float32)

        # Numerically-stable softmax; approx reciprocal uses the EUP slot.
        m = jnp.max(s, axis=-1, keepdims=True)
        if cdt == jnp.bfloat16:
            # bf16 exp roughly doubles EUP throughput on v6e/v7x.
            e = jnp.exp((s - m).astype(jnp.bfloat16))
            denom = jnp.sum(e.astype(jnp.float32), axis=-1, keepdims=True)
        else:
            e = jnp.exp(s - m)
            denom = jnp.sum(e, axis=-1, keepdims=True)
        inv = pl.reciprocal(denom, approx=True)
        attn = (e * inv).astype(cdt)                                 # (tq, N)

        # Store this head's result directly into its output stripe (no concat).
        o_ref[0, :, sl] = jnp.dot(
            attn, v_h, preferred_element_type=jnp.float32).astype(o_ref.dtype)


def fuse_qkv_params(params, n_heads, d_head, compute_dtype):
    """Pack per-head q/k/v Linear params into one (d, 3d) weight + (1, 3d) bias.

    One-time parameter transform:
      * heads go block-diagonal so the fused matmul on the original (N, d)
        layout reproduces the per-head projections,
      * q weights/bias are pre-scaled by 1/sqrt(d_head).
    """
    d = n_heads * d_head
    scale = 1.0 / math.sqrt(d_head)
    eye = jnp.eye(n_heads, dtype=jnp.float32)

    def block_diag(w):  # (H, d_head, d_head) -> (d, d)
        return jnp.einsum("hio,hg->higo", w, eye).reshape(d, d)

    wq = block_diag(params["wq"]) * scale
    wk = block_diag(params["wk"])
    wv = block_diag(params["wv"])
    bq = params["bq"].reshape(1, d) * scale
    bk = params["bk"].reshape(1, d)
    bv = params["bv"].reshape(1, d)

    w_qkv = jnp.concatenate([wq, wk, wv], axis=-1).astype(compute_dtype)  # (d, 3d)
    b_qkv = jnp.concatenate([bq, bk, bv], axis=-1).astype(jnp.float32)    # (1, 3d)
    return w_qkv, b_qkv


def _vmem_limit_bytes():
    # ~75% of physical VMEM: 96 MiB on v5e/v6e (128 MiB), 48 MiB on v7x (64 MiB).
    try:
        return int(pltpu.get_tpu_info().vmem_capacity_bytes * 3 // 4)
    except Exception:
        return 48 * 1024 * 1024


def _choose_tq(n):
    # Full-sequence query tile for short sequences; 128/256-row tiles otherwise
    # (keeps the MXU M dim >= 128 and the (tq, N) score block small in VMEM).
    if n <= 256:
        return n
    for cand in (256, 128, 64, 32, 16, 8):
        if n % cand == 0:
            return cand
    return n


def my_msa_pallas(x, params, n_heads, compute_dtype=jnp.float32, tq=None):
    """x: (B, N, d) float32. params: dict of per-head weights/biases."""
    B, N, d = x.shape
    d_head = d // n_heads
    w_qkv, b_qkv = fuse_qkv_params(params, n_heads, d_head, compute_dtype)
    x_in = x.astype(compute_dtype)   # bf16 at the boundary halves the x DMA
    tq = _choose_tq(N) if tq is None else tq
    assert N % tq == 0
    n_q_tiles = N // tq

    kernel = functools.partial(_msa_kernel, n_heads=n_heads, d_head=d_head, tq=tq)

    def build(single_buffer_weights):
        const_kw = (dict(pipeline_mode=pl.Buffered(1))
                    if single_buffer_weights else {})
        # Block shapes equal the full array extents on the last two dims
        # (legal regardless of (8, 128) granularity at these sizes); output
        # last dim is d (lane-dense).
        x_spec = pl.BlockSpec((1, N, d), lambda b, qi: (b, 0, 0))
        w_spec = pl.BlockSpec((d, 3 * d), lambda b, qi: (0, 0), **const_kw)
        b_spec = pl.BlockSpec((1, 3 * d), lambda b, qi: (0, 0), **const_kw)
        o_spec = pl.BlockSpec((1, tq, d), lambda b, qi: (b, qi, 0))
        return pl.pallas_call(
            kernel,
            out_shape=jax.ShapeDtypeStruct((B, N, d), jnp.float32),
            grid=(B, n_q_tiles),
            in_specs=[x_spec, w_spec, b_spec],
            out_specs=o_spec,
            scratch_shapes=[pltpu.VMEM((N, 2 * d), compute_dtype)],
            compiler_params=pltpu.CompilerParams(
                # Batch axis shards across v7x's 2 TCs; the query-tile axis
                # must stay sequential ("arbitrary") because the K/V scratch
                # is filled at qi == 0 and reused for qi > 0.
                dimension_semantics=("parallel", "arbitrary"),
                vmem_limit_bytes=_vmem_limit_bytes()),
        )

    try:
        out = build(single_buffer_weights=True)(x_in, w_qkv, b_qkv)
        return jax.block_until_ready(out)
    except Exception:
        # Installed JAX may not support BlockSpec(pipeline_mode=...); fall back
        # to default (double-buffered) constant operands.
        out = build(single_buffer_weights=False)(x_in, w_qkv, b_qkv)
        return jax.block_until_ready(out)


def init_params(key, n_heads, d_head):
    # Deterministic init mimicking nn.Linear's uniform(-1/sqrt(in), 1/sqrt(in)).
    bound = 1.0 / math.sqrt(d_head)
    keys = jax.random.split(key, 6)
    shape_w = (n_heads, d_head, d_head)   # stored (in, out) so math is x @ W
    shape_b = (n_heads, 1, d_head)
    u = lambda k, s: jax.random.uniform(k, s, jnp.float32, -bound, bound)
    return {
        "wq": u(keys[0], shape_w), "bq": u(keys[1], shape_b),
        "wk": u(keys[2], shape_w), "bk": u(keys[3], shape_b),
        "wv": u(keys[4], shape_w), "bv": u(keys[5], shape_b),
    }


def my_msa_reference(x, params, n_heads):
    """Pure-JAX reference replicating the PyTorch forward loop semantics."""
    B, N, d = x.shape
    d_head = d // n_heads
    outs = []
    for b in range(B):
        head_outs = []
        for h in range(n_heads):
            seq = x[b, :, h * d_head:(h + 1) * d_head]
            q = seq @ params["wq"][h] + params["bq"][h]
            k = seq @ params["wk"][h] + params["bk"][h]
            v = seq @ params["wv"][h] + params["bv"][h]
            attn = jax.nn.softmax(q @ k.T / math.sqrt(d_head), axis=-1)
            head_outs.append(attn @ v)
        outs.append(jnp.concatenate(head_outs, axis=-1))
    return jnp.stack(outs, axis=0)


if __name__ == "__main__":
    B, N, d, n_heads = 2, 8, 32, 2
    d_head = d // n_heads

    key = jax.random.PRNGKey(0)
    kx, kp = jax.random.split(key)
    x = jax.random.normal(kx, (B, N, d), dtype=jnp.float32)
    params = init_params(kp, n_heads, d_head)

    ref = my_msa_reference(x, params, n_heads)

    # f32 MXU operands (tolerance accommodates the approx EUP reciprocal).
    out = my_msa_pallas(x, params, n_heads, compute_dtype=jnp.float32)
    out = jax.block_until_ready(out)
    assert out.shape == (B, N, d)
    assert jnp.allclose(out, ref, atol=5e-3, rtol=5e-3), "f32 path mismatch vs reference"

    # bf16 MXU operands + bf16 exp with f32 accumulation (v6e/v7x throughput path).
    out_bf16 = my_msa_pallas(x, params, n_heads, compute_dtype=jnp.bfloat16)
    out_bf16 = jax.block_until_ready(out_bf16)
    assert jnp.allclose(out_bf16, ref, atol=5e-2, rtol=5e-2), "bf16 path mismatch vs reference"

    print("KERNEL_OK")
</pallas_src>

<mosaic_0001>
module attributes {stable_mosaic.version = 11 : i64} {
  func.func @_msa_kernel(%arg0: i32, %arg1: i32, %arg2: memref<1x8x32xf32, #tpu.memory_space<vmem>>, %arg3: memref<32x96xf32, #tpu.memory_space<vmem>>, %arg4: memref<1x96xf32, #tpu.memory_space<vmem>>, %arg5: memref<1x8x32xf32, #tpu.memory_space<vmem>>, %arg6: memref<8x64xf32, #tpu.memory_space<vmem>>) attributes {dimension_semantics = [#tpu.dimension_semantics<parallel>, #tpu.dimension_semantics<arbitrary>], iteration_bounds = array<i64: 2, 1>, scalar_prefetch = 0 : i64, scratch_operands = 1 : i64, tpu.core_type = #tpu.core_type<tc>, window_params = [{transform_indices = @transform_0, window_bounds = array<i64: 1, 8, 32>}, {pipeline_mode = #tpu.pipeline_mode<synchronous>, transform_indices = @transform_1, window_bounds = array<i64: 32, 96>}, {pipeline_mode = #tpu.pipeline_mode<synchronous>, transform_indices = @transform_2, window_bounds = array<i64: 1, 96>}, {transform_indices = @transform_3, window_bounds = array<i64: 1, 8, 32>}]} {
    %c0_i32 = arith.constant 0 : i32
    %0 = arith.cmpi eq, %arg1, %c0_i32 : i32
    %1 = arith.extui %0 : i1 to i32
    %c0_i32_0 = arith.constant 0 : i32
    %2 = arith.cmpi ne, %1, %c0_i32_0 : i32
    scf.if %2 {
      %c0_25 = arith.constant 0 : index
      %c0_26 = arith.constant 0 : index
      %c0_27 = arith.constant 0 : index
      %49 = vector.load %arg2[%c0_25, %c0_26, %c0_27] : memref<1x8x32xf32, #tpu.memory_space<vmem>>, vector<1x8x32xf32>
      %50 = vector.shape_cast %49 : vector<1x8x32xf32> to vector<8x32xf32>
      %c0_28 = arith.constant 0 : index
      %c32_29 = arith.constant 32 : index
      %51 = vector.load %arg3[%c0_28, %c32_29] : memref<32x96xf32, #tpu.memory_space<vmem>>, vector<32x64xf32>
      %cst_30 = arith.constant dense<0.000000e+00> : vector<8x64xf32>
      %52 = tpu.matmul %50, %51, %cst_30 {dimension_numbers = #tpu.dot_dimension_numbers<[1], [0], [0], [1], [0, 0, 1, 1], [], []>} : vector<8x32xf32>, vector<32x64xf32>, vector<8x64xf32> -> vector<8x64xf32>
      %c0_31 = arith.constant 0 : index
      %c32_32 = arith.constant 32 : index
      %53 = vector.load %arg4[%c0_31, %c32_32] : memref<1x96xf32, #tpu.memory_space<vmem>>, vector<1x64xf32>
      %54 = vector.broadcast %53 : vector<1x64xf32> to vector<8x64xf32>
      %55 = arith.addf %52, %54 : vector<8x64xf32>
      %c0_33 = arith.constant 0 : index
      %c0_34 = arith.constant 0 : index
      %56 = vector.load %arg6[%c0_33, %c0_34] : memref<8x64xf32, #tpu.memory_space<vmem>>, vector<8x64xf32>
      tpu.vector_store %arg6[%c0_33, %c0_34], %55 {strides = array<i32>} : memref<8x64xf32, #tpu.memory_space<vmem>>, vector<8x64xf32>,
    } else {
    }
    %c8_i32 = arith.constant 8 : i32
    %3 = arith.muli %arg1, %c8_i32 : i32
    %4 = tpu.assume_multiple %3, 8 : i32
    %c0 = arith.constant 0 : index
    %5 = arith.index_cast %4 : i32 to index
    %c0_1 = arith.constant 0 : index
    %6 = vector.load %arg2[%c0, %5, %c0_1] : memref<1x8x32xf32, #tpu.memory_space<vmem>>, vector<1x8x32xf32>
    %7 = vector.shape_cast %6 : vector<1x8x32xf32> to vector<8x32xf32>
    %c0_2 = arith.constant 0 : index
    %c0_3 = arith.constant 0 : index
    %8 = vector.load %arg3[%c0_2, %c0_3] : memref<32x96xf32, #tpu.memory_space<vmem>>, vector<32x32xf32>
    %cst = arith.constant dense<0.000000e+00> : vector<8x32xf32>
    %9 = tpu.matmul %7, %8, %cst {dimension_numbers = #tpu.dot_dimension_numbers<[1], [0], [0], [1], [0, 0, 1, 1], [], []>} : vector<8x32xf32>, vector<32x32xf32>, vector<8x32xf32> -> vector<8x32xf32>
    %c0_4 = arith.constant 0 : index
    %c0_5 = arith.constant 0 : index
    %10 = vector.load %arg4[%c0_4, %c0_5] : memref<1x96xf32, #tpu.memory_space<vmem>>, vector<1x32xf32>
    %11 = vector.broadcast %10 : vector<1x32xf32> to vector<8x32xf32>
    %12 = arith.addf %9, %11 : vector<8x32xf32>
    %c0_6 = arith.constant 0 : index
    %c0_7 = arith.constant 0 : index
    %13 = vector.load %arg6[%c0_6, %c0_7] : memref<8x64xf32, #tpu.memory_space<vmem>>, vector<8x16xf32>
    %c0_8 = arith.constant 0 : index
    %c32 = arith.constant 32 : index
    %14 = vector.load %arg6[%c0_8, %c32] : memref<8x64xf32, #tpu.memory_space<vmem>>, vector<8x16xf32>
    %15 = vector.extract_strided_slice %12 {offsets = [0, 0], sizes = [8, 16], strides = [1, 1]} : vector<8x32xf32> to vector<8x16xf32>
    %cst_9 = arith.constant dense<0.000000e+00> : vector<8x8xf32>
    %16 = tpu.matmul %15, %13, %cst_9 {dimension_numbers = #tpu.dot_dimension_numbers<[1], [1], [0], [0], [0, 0, 1, 0], [], []>} : vector<8x16xf32>, vector<8x16xf32>, vector<8x8xf32> -> vector<8x8xf32>
    %cst_10 = arith.constant dense<0xFF800000> : vector<8xf32>
    %17 = vector.multi_reduction <maximumf>, %16, %cst_10 [1] : vector<8x8xf32> to vector<8xf32>
    %18 = vector.shape_cast %17 : vector<8xf32> to vector<8x1xf32>
    %19 = vector.broadcast %18 : vector<8x1xf32> to vector<8x8xf32>
    %20 = arith.subf %16, %19 : vector<8x8xf32>
    %21 = math.exp %20 : vector<8x8xf32>
    %cst_11 = arith.constant dense<0.000000e+00> : vector<8xf32>
    %22 = vector.multi_reduction <add>, %21, %cst_11 [1] : vector<8x8xf32> to vector<8xf32>
    %23 = vector.shape_cast %22 : vector<8xf32> to vector<8x1xf32>
    %24 = tpu.reciprocal %23 {approx = true} : vector<8x1xf32> -> vector<8x1xf32>
    %25 = vector.broadcast %24 : vector<8x1xf32> to vector<8x8xf32>
    %26 = arith.mulf %21, %25 : vector<8x8xf32>
    %cst_12 = arith.constant dense<0.000000e+00> : vector<8x16xf32>
    %27 = tpu.matmul %26, %14, %cst_12 {dimension_numbers = #tpu.dot_dimension_numbers<[1], [0], [0], [1], [0, 0, 1, 1], [], []>} : vector<8x8xf32>, vector<8x16xf32>, vector<8x16xf32> -> vector<8x16xf32>
    %c0_13 = arith.constant 0 : index
    %c0_14 = arith.constant 0 : index
    %c0_15 = arith.constant 0 : index
    %28 = vector.load %arg5[%c0_13, %c0_14, %c0_15] : memref<1x8x32xf32, #tpu.memory_space<vmem>>, vector<1x8x16xf32>
    %29 = vector.shape_cast %28 : vector<1x8x16xf32> to vector<8x16xf32>
    %30 = vector.shape_cast %27 : vector<8x16xf32> to vector<1x8x16xf32>
    tpu.vector_store %arg5[%c0_13, %c0_14, %c0_15], %30 {strides = array<i32>} : memref<1x8x32xf32, #tpu.memory_space<vmem>>, vector<1x8x16xf32>,
    %c0_16 = arith.constant 0 : index
    %c16 = arith.constant 16 : index
    %31 = vector.load %arg6[%c0_16, %c16] : memref<8x64xf32, #tpu.memory_space<vmem>>, vector<8x16xf32>
    %c0_17 = arith.constant 0 : index
    %c48 = arith.constant 48 : index
    %32 = vector.load %arg6[%c0_17, %c48] : memref<8x64xf32, #tpu.memory_space<vmem>>, vector<8x16xf32>
    %33 = vector.extract_strided_slice %12 {offsets = [0, 16], sizes = [8, 16], strides = [1, 1]} : vector<8x32xf32> to vector<8x16xf32>
    %cst_18 = arith.constant dense<0.000000e+00> : vector<8x8xf32>
    %34 = tpu.matmul %33, %31, %cst_18 {dimension_numbers = #tpu.dot_dimension_numbers<[1], [1], [0], [0], [0, 0, 1, 0], [], []>} : vector<8x16xf32>, vector<8x16xf32>, vector<8x8xf32> -> vector<8x8xf32>
    %cst_19 = arith.constant dense<0xFF800000> : vector<8xf32>
    %35 = vector.multi_reduction <maximumf>, %34, %cst_19 [1] : vector<8x8xf32> to vector<8xf32>
    %36 = vector.shape_cast %35 : vector<8xf32> to vector<8x1xf32>
    %37 = vector.broadcast %36 : vector<8x1xf32> to vector<8x8xf32>
    %38 = arith.subf %34, %37 : vector<8x8xf32>
    %39 = math.exp %38 : vector<8x8xf32>
    %cst_20 = arith.constant dense<0.000000e+00> : vector<8xf32>
    %40 = vector.multi_reduction <add>, %39, %cst_20 [1] : vector<8x8xf32> to vector<8xf32>
    %41 = vector.shape_cast %40 : vector<8xf32> to vector<8x1xf32>
    %42 = tpu.reciprocal %41 {approx = true} : vector<8x1xf32> -> vector<8x1xf32>
    %43 = vector.broadcast %42 : vector<8x1xf32> to vector<8x8xf32>
    %44 = arith.mulf %39, %43 : vector<8x8xf32>
    %cst_21 = arith.constant dense<0.000000e+00> : vector<8x16xf32>
    %45 = tpu.matmul %44, %32, %cst_21 {dimension_numbers = #tpu.dot_dimension_numbers<[1], [0], [0], [1], [0, 0, 1, 1], [], []>} : vector<8x8xf32>, vector<8x16xf32>, vector<8x16xf32> -> vector<8x16xf32>
    %c0_22 = arith.constant 0 : index
    %c0_23 = arith.constant 0 : index
    %c16_24 = arith.constant 16 : index
    %46 = vector.load %arg5[%c0_22, %c0_23, %c16_24] : memref<1x8x32xf32, #tpu.memory_space<vmem>>, vector<1x8x16xf32>
    %47 = vector.shape_cast %46 : vector<1x8x16xf32> to vector<8x16xf32>
    %48 = vector.shape_cast %45 : vector<8x16xf32> to vector<1x8x16xf32>
    tpu.vector_store %arg5[%c0_22, %c0_23, %c16_24], %48 {strides = array<i32>} : memref<1x8x32xf32, #tpu.memory_space<vmem>>, vector<1x8x16xf32>,
    return
  }
  func.func @transform_0(%arg0: i32, %arg1: i32) -> (i32, i32, i32) {
    %c0_i32 = arith.constant 0 : i32
    %c0_i32_0 = arith.constant 0 : i32
    %c0_i32_1 = arith.constant 0 : i32
    return %arg0, %c0_i32, %c0_i32_0 : i32, i32, i32
  }
  func.func @transform_1(%arg0: i32, %arg1: i32) -> (i32, i32) {
    %c0_i32 = arith.constant 0 : i32
    %c0_i32_0 = arith.constant 0 : i32
    %c0_i32_1 = arith.constant 0 : i32
    return %c0_i32, %c0_i32_0 : i32, i32
  }
  func.func @transform_2(%arg0: i32, %arg1: i32) -> (i32, i32) {
    %c0_i32 = arith.constant 0 : i32
    %c0_i32_0 = arith.constant 0 : i32
    %c0_i32_1 = arith.constant 0 : i32
    return %c0_i32, %c0_i32_0 : i32, i32
  }
  func.func @transform_3(%arg0: i32, %arg1: i32) -> (i32, i32, i32) {
    %c0_i32 = arith.constant 0 : i32
    %c0_i32_0 = arith.constant 0 : i32
    return %arg0, %arg1, %c0_i32 : i32, i32, i32
  }
}

module attributes {stable_mosaic.version = 11 : i64} {
  func.func @_msa_kernel(%arg0: i32, %arg1: i32, %arg2: memref<1x8x32xf32, #tpu.memory_space<vmem>>, %arg3: memref<32x96xf32, #tpu.memory_space<vmem>>, %arg4: memref<1x96xf32, #tpu.memory_space<vmem>>, %arg5: memref<1x8x32xf32, #tpu.memory_space<vmem>>, %arg6: memref<8x64xf32, #tpu.memory_space<vmem>>) attributes {dimension_semantics = [#tpu.dimension_semantics<parallel>, #tpu.dimension_semantics<arbitrary>], iteration_bounds = array<i64: 2, 1>, scalar_prefetch = 0 : i64, scratch_operands = 1 : i64, tpu.core_type = #tpu.core_type<tc>, window_params = [{transform_indices = @transform_0, window_bounds = array<i64: 1, 8, 32>}, {pipeline_mode = #tpu.pipeline_mode<synchronous>, transform_indices = @transform_1, window_bounds = array<i64: 32, 96>}, {pipeline_mode = #tpu.pipeline_mode<synchronous>, transform_indices = @transform_2, window_bounds = array<i64: 1, 96>}, {transform_indices = @transform_3, window_bounds = array<i64: 1, 8, 32>}]} {
    %c0_i32 = arith.constant 0 : i32
    %0 = arith.cmpi eq, %arg1, %c0_i32 : i32
    %1 = arith.extui %0 : i1 to i32
    %c0_i32_0 = arith.constant 0 : i32
    %2 = arith.cmpi ne, %1, %c0_i32_0 : i32
    scf.if %2 {
      %c0_25 = arith.constant 0 : index
      %c0_26 = arith.constant 0 : index
      %c0_27 = arith.constant 0 : index
      %49 = vector.load %arg2[%c0_25, %c0_26, %c0_27] : memref<1x8x32xf32, #tpu.memory_space<vmem>>, vector<1x8x32xf32>
      %50 = vector.shape_cast %49 : vector<1x8x32xf32> to vector<8x32xf32>
      %c0_28 = arith.constant 0 : index
      %c32_29 = arith.constant 32 : index
      %51 = vector.load %arg3[%c0_28, %c32_29] : memref<32x96xf32, #tpu.memory_space<vmem>>, vector<32x64xf32>
      %cst_30 = arith.constant dense<0.000000e+00> : vector<8x64xf32>
      %52 = tpu.matmul %50, %51, %cst_30 {dimension_numbers = #tpu.dot_dimension_numbers<[1], [0], [0], [1], [0, 0, 1, 1], [], []>} : vector<8x32xf32>, vector<32x64xf32>, vector<8x64xf32> -> vector<8x64xf32>
      %c0_31 = arith.constant 0 : index
      %c32_32 = arith.constant 32 : index
      %53 = vector.load %arg4[%c0_31, %c32_32] : memref<1x96xf32, #tpu.memory_space<vmem>>, vector<1x64xf32>
      %54 = vector.broadcast %53 : vector<1x64xf32> to vector<8x64xf32>
      %55 = arith.addf %52, %54 : vector<8x64xf32>
      %c0_33 = arith.constant 0 : index
      %c0_34 = arith.constant 0 : index
      %56 = vector.load %arg6[%c0_33, %c0_34] : memref<8x64xf32, #tpu.memory_space<vmem>>, vector<8x64xf32>
      tpu.vector_store %arg6[%c0_33, %c0_34], %55 {strides = array<i32>} : memref<8x64xf32, #tpu.memory_space<vmem>>, vector<8x64xf32>,
    } else {
    }
    %c8_i32 = arith.constant 8 : i32
    %3 = arith.muli %arg1, %c8_i32 : i32
    %4 = tpu.assume_multiple %3, 8 : i32
    %c0 = arith.constant 0 : index
    %5 = arith.index_cast %4 : i32 to index
    %c0_1 = arith.constant 0 : index
    %6 = vector.load %arg2[%c0, %5, %c0_1] : memref<1x8x32xf32, #tpu.memory_space<vmem>>, vector<1x8x32xf32>
    %7 = vector.shape_cast %6 : vector<1x8x32xf32> to vector<8x32xf32>
    %c0_2 = arith.constant 0 : index
    %c0_3 = arith.constant 0 : index
    %8 = vector.load %arg3[%c0_2, %c0_3] : memref<32x96xf32, #tpu.memory_space<vmem>>, vector<32x32xf32>
    %cst = arith.constant dense<0.000000e+00> : vector<8x32xf32>
    %9 = tpu.matmul %7, %8, %cst {dimension_numbers = #tpu.dot_dimension_numbers<[1], [0], [0], [1], [0, 0, 1, 1], [], []>} : vector<8x32xf32>, vector<32x32xf32>, vector<8x32xf32> -> vector<8x32xf32>
    %c0_4 = arith.constant 0 : index
    %c0_5 = arith.constant 0 : index
    %10 = vector.load %arg4[%c0_4, %c0_5] : memref<1x96xf32, #tpu.memory_space<vmem>>, vector<1x32xf32>
    %11 = vector.broadcast %10 : vector<1x32xf32> to vector<8x32xf32>
    %12 = arith.addf %9, %11 : vector<8x32xf32>
    %c0_6 = arith.constant 0 : index
    %c0_7 = arith.constant 0 : index
    %13 = vector.load %arg6[%c0_6, %c0_7] : memref<8x64xf32, #tpu.memory_space<vmem>>, vector<8x16xf32>
    %c0_8 = arith.constant 0 : index
    %c32 = arith.constant 32 : index
    %14 = vector.load %arg6[%c0_8, %c32] : memref<8x64xf32, #tpu.memory_space<vmem>>, vector<8x16xf32>
    %15 = vector.extract_strided_slice %12 {offsets = [0, 0], sizes = [8, 16], strides = [1, 1]} : vector<8x32xf32> to vector<8x16xf32>
    %cst_9 = arith.constant dense<0.000000e+00> : vector<8x8xf32>
    %16 = tpu.matmul %15, %13, %cst_9 {dimension_numbers = #tpu.dot_dimension_numbers<[1], [1], [0], [0], [0, 0, 1, 0], [], []>} : vector<8x16xf32>, vector<8x16xf32>, vector<8x8xf32> -> vector<8x8xf32>
    %cst_10 = arith.constant dense<0xFF800000> : vector<8xf32>
    %17 = vector.multi_reduction <maximumf>, %16, %cst_10 [1] : vector<8x8xf32> to vector<8xf32>
    %18 = vector.shape_cast %17 : vector<8xf32> to vector<8x1xf32>
    %19 = vector.broadcast %18 : vector<8x1xf32> to vector<8x8xf32>
    %20 = arith.subf %16, %19 : vector<8x8xf32>
    %21 = math.exp %20 : vector<8x8xf32>
    %cst_11 = arith.constant dense<0.000000e+00> : vector<8xf32>
    %22 = vector.multi_reduction <add>, %21, %cst_11 [1] : vector<8x8xf32> to vector<8xf32>
    %23 = vector.shape_cast %22 : vector<8xf32> to vector<8x1xf32>
    %24 = tpu.reciprocal %23 {approx = true} : vector<8x1xf32> -> vector<8x1xf32>
    %25 = vector.broadcast %24 : vector<8x1xf32> to vector<8x8xf32>
    %26 = arith.mulf %21, %25 : vector<8x8xf32>
    %cst_12 = arith.constant dense<0.000000e+00> : vector<8x16xf32>
    %27 = tpu.matmul %26, %14, %cst_12 {dimension_numbers = #tpu.dot_dimension_numbers<[1], [0], [0], [1], [0, 0, 1, 1], [], []>} : vector<8x8xf32>, vector<8x16xf32>, vector<8x16xf32> -> vector<8x16xf32>
    %c0_13 = arith.constant 0 : index
    %c0_14 = arith.constant 0 : index
    %c0_15 = arith.constant 0 : index
    %28 = vector.load %arg5[%c0_13, %c0_14, %c0_15] : memref<1x8x32xf32, #tpu.memory_space<vmem>>, vector<1x8x16xf32>
    %29 = vector.shape_cast %28 : vector<1x8x16xf32> to vector<8x16xf32>
    %30 = vector.shape_cast %27 : vector<8x16xf32> to vector<1x8x16xf32>
    tpu.vector_store %arg5[%c0_13, %c0_14, %c0_15], %30 {strides = array<i32>} : memref<1x8x32xf32, #tpu.memory_space<vmem>>, vector<1x8x16xf32>,
    %c0_16 = arith.constant 0 : index
    %c16 = arith.constant 16 : index
    %31 = vector.load %arg6[%c0_16, %c16] : memref<8x64xf32, #tpu.memory_space<vmem>>, vector<8x16xf32>
    %c0_17 = arith.constant 0 : index
    %c48 = arith.constant 48 : index
    %32 = vector.load %arg6[%c0_17, %c48] : memref<8x64xf32, #tpu.memory_space<vmem>>, vector<8x16xf32>
    %33 = vector.extract_strided_slice %12 {offsets = [0, 16], sizes = [8, 16], strides = [1, 1]} : vector<8x32xf32> to vector<8x16xf32>
    %cst_18 = arith.constant dense<0.000000e+00> : vector<8x8xf32>
    %34 = tpu.matmul %33, %31, %cst_18 {dimension_numbers = #tpu.dot_dimension_numbers<[1], [1], [0], [0], [0, 0, 1, 0], [], []>} : vector<8x16xf32>, vector<8x16xf32>, vector<8x8xf32> -> vector<8x8xf32>
    %cst_19 = arith.constant dense<0xFF800000> : vector<8xf32>
    %35 = vector.multi_reduction <maximumf>, %34, %cst_19 [1] : vector<8x8xf32> to vector<8xf32>
    %36 = vector.shape_cast %35 : vector<8xf32> to vector<8x1xf32>
    %37 = vector.broadcast %36 : vector<8x1xf32> to vector<8x8xf32>
    %38 = arith.subf %34, %37 : vector<8x8xf32>
    %39 = math.exp %38 : vector<8x8xf32>
    %cst_20 = arith.constant dense<0.000000e+00> : vector<8xf32>
    %40 = vector.multi_reduction <add>, %39, %cst_20 [1] : vector<8x8xf32> to vector<8xf32>
    %41 = vector.shape_cast %40 : vector<8xf32> to vector<8x1xf32>
    %42 = tpu.reciprocal %41 {approx = true} : vector<8x1xf32> -> vector<8x1xf32>
    %43 = vector.broadcast %42 : vector<8x1xf32> to vector<8x8xf32>
    %44 = arith.mulf %39, %43 : vector<8x8xf32>
    %cst_21 = arith.constant dense<0.000000e+00> : vector<8x16xf32>
    %45 = tpu.matmul %44, %32, %cst_21 {dimension_numbers = #tpu.dot_dimension_numbers<[1], [0], [0], [1], [0, 0, 1, 1], [], []>} : vector<8x8xf32>, vector<8x16xf32>, vector<8x16xf32> -> vector<8x16xf32>
    %c0_22 = arith.constant 0 : index
    %c0_23 = arith.constant 0 : index
    %c16_24 = arith.constant 16 : index
    %46 = vector.load %arg5[%c0_22, %c0_23, %c16_24] : memref<1x8x32xf32, #tpu.memory_space<vmem>>, vector<1x8x16xf32>
    %47 = vector.shape_cast %46 : vector<1x8x16xf32> to vector<8x16xf32>
    %48 = vector.shape_cast %45 : vector<8x16xf32> to vector<1x8x16xf32>
    tpu.vector_store %arg5[%c0_22, %c0_23, %c16_24], %48 {strides = array<i32>} : memref<1x8x32xf32, #tpu.memory_space<vmem>>, vector<1x8x16xf32>,
    return
  }
  func.func @transform_0(%arg0: i32, %arg1: i32) -> (i32, i32, i32) {
    %c0_i32 = arith.constant 0 : i32
    %c0_i32_0 = arith.constant 0 : i32
    %c0_i32_1 = arith.constant 0 : i32
    return %arg0, %c0_i32, %c0_i32_0 : i32, i32, i32
  }
  func.func @transform_1(%arg0: i32, %arg1: i32) -> (i32, i32) {
    %c0_i32 = arith.constant 0 : i32
    %c0_i32_0 = arith.constant 0 : i32
    %c0_i32_1 = arith.constant 0 : i32
    return %c0_i32, %c0_i32_0 : i32, i32
  }
  func.func @transform_2(%arg0: i32, %arg1: i32) -> (i32, i32) {
    %c0_i32 = arith.constant 0 : i32
    %c0_i32_0 = arith.constant 0 : i32
    %c0_i32_1 = arith.constant 0 : i32
    return %c0_i32, %c0_i32_0 : i32, i32
  }
  func.func @transform_3(%arg0: i32, %arg1: i32) -> (i32, i32, i32) {
    %c0_i32 = arith.constant 0 : i32
    %c0_i32_0 = arith.constant 0 : i32
    return %arg0, %arg1, %c0_i32 : i32, i32, i32
  }
}

</mosaic_0001>

<bundles_post_ra>
// kernel: tpu_custom_call.1
= control target key start
LH: loop header
LB: loop body
LE: loop exit
PB: predicated region body
PF: predicated region fallthrough
CT: control target
= control target key end

     0   :  { %8 = vsyncpa [#allocation4], 0  ;;  %s1486_s0 = inlined_call_operand.hbm [shape: f32[2,8,32], index: 0, kind: input, shape index: {}]   ;;  %s1487_s1 = inlined_call_operand.hbm [shape: f32[32,96], index: 1, kind: input, shape index: {}]   ;;  %s1488_s2 = inlined_call_operand.vmem [shape: f32[1,96], index: 2, kind: input, shape index: {}]   ;;  %s1489_s3 = inlined_call_operand.hbm [shape: f32[2,8,32], index: 3, kind: output, shape index: {}]  }
   0x1   :  { %10 = vsyncpa [#allocation4 + $0x1], 0 }
   0x2   :  { %11 = vsyncpa [#allocation7], 0 }
   0x3   :  { %12 = vsyncpa [#allocation5], 0 }
   0x4   :  { %14 = vsyncpa [#allocation5 + $0x1], 0  ;;  %s1234_s12 = smov 0   ;;  %s1236_s13 = smov 0  }
   0x5   :  { %s1238_s14 = smov 0   ;;  %s1240_s15 = smov 0  }
   0x6   :  { %s1242_s16 = smov 0   ;;  %s1244_s17 = smov 0  }
   0x7 LB: > { %s859_s18 = sadd.s32 4294967295, %s1200_s17   ;;  %s860_s19 = sadd.s32 4294967294, %s1200_s17   ;;  %s1200_s17 = sphi %s1244_s17, %s20_s17   ;;  %s1196_s16 = sphi %s1242_s16, %s1513_s16   ;;  %s1192_s15 = sphi %s1240_s15, %s1512_s15   ;;  %s1188_s14 = sphi %s1238_s14, %s1511_s14   ;;  %s1184_s13 = sphi %s1236_s13, %s1510_s13   ;;  %s1180_s12 = sphi %s1234_s12, %s1509_s12  }
   0x8   : > { %p52_p0 = scmp.ne.s32.totalorder %s1184_s13, %s1180_s12  ;;  %p1268_p1 = scmp.eq.s32.totalorder %s859_s18, 0 }
   0x9   : > { %p1272_p2 = scmp.eq.s32.totalorder %s859_s18, 1  ;;  %p126_p3 = scmp.eq.s32.totalorder %s860_s19, 1 }
   0xa   : > { %s1494_s20 = scalar_select %p1268_p1, 1, 0 }
   0xb   : > { %s1495_s21 = scalar_select %p1272_p2, 1, 0 }
   0xc   : > { %p1278_p4 = por %p1268_p1, %p52_p0  ;;  %p861_p5 = scmp.ge.s32.totalorder %s1200_s17, 1 }
   0xd   : > { %p1283_p6 = por %p126_p3, %p52_p0  ;;  %p133_p7 = scmp.lt.s32.totalorder %s1200_s17, 3 }
   0xe   : > { %s1496_s22 = scalar_select %p1278_p4, 1, 0 }
   0xf   : > { %s1497_s23 = scalar_select %p1283_p6, 1, 0 }
  0x10   : > { %p1288_p8 = pnand %p861_p5, %p133_p7  ;;  %s1202_s25 = smov [#allocation6]  }
  0x11   : > { %s145_s26 = sshll.u32 %s1202_s25, 4  ;;  %s32_s28 = sadd.s32 1, %s1196_s16  ;;  %s146_s26 = int_to_ptr.vmem [resolvable:$true] %s145_s26 }
  0x12   : > { %s1498_s24 = scalar_select %p1288_p8, 1, 0 }
  0x13   : > { %p964_p9 = pneg %p1288_p8  ;;  %s1056_s4 = scalar_lea.hbm %s1487_s1, 512 }
  0x14   : > { %p1057_p12 = scmp.ne.s32.totalorder %s1487_s1, %s1056_s4  ;;  %p1063_p5 = scmp.lt.u32.totalorder %s1056_s4, %s1487_s1 }
  0x15   : > { %p1297_p11 = pnand %p964_p9, %p1268_p1 }
  0x17   : > { %p1058_p13 = pneg %p1297_p11 }
  0x19   : > { %p1059_p0 = pnand %p1058_p13, %p1057_p12 }
  0x1b   : > { %p1060_p3 = pneg %p1059_p0 }
  0x1d   : > { %p1065_p7 = pnand %p1063_p5, %p1060_p3 }
  0x1f   : > { %1068 = shalt.err (!%p1065_p7)
}
  0x20   : > { %s1069_s9 = scalar_lea.vmem %s146_s26, 512  ;;  %p1077_p1 = scmp.lt.s32.totalorder %s146_s26, %s146_s26 }
  0x21   : > { %p1070_p9 = scmp.ne.s32.totalorder %s146_s26, %s1069_s9  ;;  %p1078_p4 = scmp.lt.s32.totalorder %s1069_s9, %s1069_s9 }
  0x23   : > { %p1072_p10 = pnand %p1070_p9, %p1058_p13  ;;  %p1079_p8 = por %p1078_p4, %p1077_p1 }
  0x25   : > { %p1073_p6 = pneg %p1072_p10 }
  0x27   : > { %p1080_p2 = pnand %p1079_p8, %p1073_p6 }
  0x29   : > { %1083 = shalt.err (!%p1080_p2)
}
  0x2a   : > { %s1203_s10 = smov 128   ;;  %s1204_s11 = smov 8  }
  0x2b   : > { %967 = dma.hbm_to_vmem [thread:$0]  (!%p1297_p11), %s1487_s1, 512, %s146_s26, [#allocation7], %s1203_s10, %s1203_s10, %s1204_s11  }
  0x2c   : > { %p34_p1 = scmp.ge.s32.totalorder %s32_s28, 2  ;;  %s39_s25 = sadd.s32 1, %s1188_s14 }
  0x2d   : > { %p46_p2 = scmp.ne.s32.totalorder %s1188_s14, %s1184_s13  ;;  %p47_p4 = scmp.eq.s32.totalorder %s1200_s17, 0 }
  0x2e   : > { %s1515_s28 = smov (%p34_p1, %s32_s28), 0  ;;  %p1501_p8 = scmp.ne.s32.totalorder %s1495_s21, 0 }
  0x2f   : > { %p1324_p6 = por %p47_p4, %p46_p2  ;;  %s36_s27 = ssub.s32 %s1196_s16, %s1515_s28 }
  0x30   : > { %p1330_p10 = por %p1501_p8, %p46_p2  ;;  %p977_p12 = scmp.lt.s32.totalorder %s1200_s17, 2 }
  0x31   : > { %p37_p11 = scmp.eq.s32.totalorder %s36_s27, 0  ;;  %s162_s26 = sand.u32 1, %s1188_s14  }
  0x32   : > { %s864_s4 = sshll.u32 %s162_s26, 3  ;;  %s865_s6 = sshll.u32 %s1196_s16, 7 }
  0x33   : > { %s1339_s5 = scalar_select %p37_p11, %s1188_s14, %s39_s25  }
  0x34   : > { %s1345_s9 = scalar_lea.hbm %s1486_s0, %s865_s6  ;;  %s166_s21 = scalar_lea.vmem [#allocation3], %s864_s4 }
  0x35   : > { %s173_s10 = sshll.u32 %s166_s21, 4  ;;  %p1351_p13 = pnand %p977_p12, %p1324_p6  ;;  %s1347_s10 = int_to_ptr.vmem [resolvable:$true] %s173_s10 }
  0x36   : > { %s163_s18 = scalar_lea.sflag [#allocation4], %s162_s26  ;;  %s1084_s19 = scalar_lea.hbm %s1345_s9, 128 }
  0x37   : > { %p1085_p0 = scmp.ne.s32.totalorder %s1345_s9, %s1084_s19  ;;  %p1086_p3 = pneg %p1351_p13 }
  0x38   : > { %s1089_s4 = scalar_lea.hbm %s1486_s0, 256  ;;  %p1090_p9 = scmp.lt.u32.totalorder %s1345_s9, %s1486_s0 }
  0x39   : > { %p1087_p5 = pnand %p1086_p3, %p1085_p0  ;;  %p1091_p1 = scmp.lt.u32.totalorder %s1089_s4, %s1084_s19 }
  0x3a   : > { %p1093_p4 = scmp.lt.u32.totalorder %s1084_s19, %s1345_s9 }
  0x3b   : > { %p1088_p7 = pneg %p1087_p5  ;;  %p1092_p2 = por %p1091_p1, %p1090_p9 }
  0x3d   : > { %p1094_p6 = por %p1093_p4, %p1092_p2 }
  0x3f   : > { %p1095_p8 = pnand %p1094_p6, %p1088_p7 }
  0x41   : > { %1098 = shalt.err (!%p1095_p8)
}
  0x42   : > { %s1099_s26 = scalar_lea.vmem %s1347_s10, 128  ;;  %s1205_s7 = smov [#allocation3]  }
  0x43   : > { %p1100_p12 = scmp.ne.s32.totalorder %s1347_s10, %s1099_s26  ;;  %s1104_s8 = sshll.u32 %s1205_s7, 4  ;;  %s1105_s8 = int_to_ptr.vmem [resolvable:$false] %s1104_s8 }
  0x44   : > { %s1106_s21 = scalar_lea.vmem %s1105_s8, 256  ;;  %p1107_p5 = scmp.lt.s32.totalorder %s1347_s10, %s1105_s8 }
  0x45   : > { %p1102_p11 = pnand %p1100_p12, %p1086_p3  ;;  %p1108_p9 = scmp.lt.s32.totalorder %s1106_s21, %s1099_s26 }
  0x47   : > { %p1103_p0 = pneg %p1102_p11  ;;  %p1109_p1 = por %p1108_p9, %p1107_p5 }
  0x49   : > { %p1110_p2 = pnand %p1109_p1, %p1103_p0 }
  0x4b   : > { %1113 = shalt.err (!%p1110_p2)
}
  0x4c   : > { %971 = dma.hbm_to_vmem [thread:$0]  (!%p1351_p13), %s1345_s9, 128, %s1347_s10, %s163_s18  }
  0x4d   : > { %p1504_p7 = scmp.ne.s32.totalorder %s1498_s24, 0 }
  0x4e   : > { %s1383_s19 = sand.u32 (!%p1504_p7), 1, %s1184_s13   ;;  %p1505_p3 = scmp.ne.s32.totalorder (!%p1504_p7), %s1496_s22, 0 }
  0x4f   : > { %182 = sbr.rel (%p1504_p7) target bundleno = 1427 (0x593), region = 32  ;;  %s867_s25 = sshll.u32 (!%p1504_p7), %s1383_s19, 3 }
  0x50   : > { %s185_s27 = scalar_lea.sflag (!%p1504_p7), [#allocation4], %s1383_s19  ;;  %s188_s4 = scalar_lea.vmem (!%p1504_p7), [#allocation3], %s867_s25 }
  0x56   : > { %1167 = dma.done.wait (%p1505_p3), %s185_s27, 128  }
  0x57   : > { %1169 = vsyncadd (%p1505_p3), %s185_s27, 4294967168  ;;  %p1506_p13 = scmp.ne.s32.totalorder %s1494_s20, 0 }
  0x59   : > { %1171 = dma.done.wait (%p1506_p13), [#allocation7], 512  }
  0x5a   : > { %1173 = vsyncadd (%p1506_p13), [#allocation7], 4294966784  ;;  %v1206_v0 = vmov 0.0|0.0   ;;  %vm1207_vm0 = vmmov 0   ;;  %v1208_v1 = vmov 0.0   ;;  %v220_v2 = vld [vmem:[#allocation6] sm:$0xff] }
  0x5b   : > { %944 = vmatprep.subr.bf16.mxu0 %v1206_v0  ;;  %950 = vmatprep.subr.bf16.mxu1 %v1206_v0  ;;  %v221_v3 = vld [vmem:[#allocation6 + $0x8] sm:$0xff]  ;;  %v222_v4 = vld [vmem:[#allocation6 + $0x10] sm:$0xff]  ;;  %v223_v6 = vld [vmem:[#allocation6 + $0x18] sm:$0xff]  ;;  %s1209_s24 = smov 96   ;;  %vm249_vm1 = vcmask 261120   ;;  %s1210_s9 = smov 112  }
  0x5c   : > { %910 = vmatprep.mubr.msk.f32.mxu0 %vm1207_vm0, %v1208_v1  ;;  %921 = vmatprep.mubr.msk.f32.mxu1 %vm1207_vm0, %v1208_v1  ;;  %v1038_v5 = vpack.i.bf16 %v221_v3, %v220_v2  ;;  %v951_v7 = vpack.c.bf16 %v221_v3, %v220_v2  ;;  %v870_v8 = vld [vmem:[%s1488_s2] ss:$0 sm:$0xff]  ;;  %v1043_v9 = vpack.i.bf16 %v223_v6, %v222_v4  ;;  %v219_v11 = vld [vmem:[%s188_s4] sm:$0xff]  ;;  %vm323_vm2 = vcmask 523264   ;;  %s1211_s10 = smov 80   ;;  %s214_s11 = scalar_lea.vmem [#allocation8], %s867_s25 }
  0x5d   : > { %246 = vrot.lane.b32.xlu1 %v870_v8, %s1209_s24  ;;  %v954_v10 = vpack.c.bf16 %v223_v6, %v222_v4  ;;  %vm414_vm3 = vcmask 130048   ;;  %vm491_vm4 = vcmask 64512   ;;  %s1212_s18 = smov 16   ;;  %s881_s29 = sshll.u32 %s1192_s15, 7  ;;  %vm751_vm5 = vcmask 261248  }
  0x5e   : > { %1039 = vrot.lane.b32.xlu0 %v1038_v5, %s1209_s24  ;;  %952 = vmatpush3.bf16.msra.mxu1 %v951_v7  ;;  %s768_s6 = sshll.u32 %s214_s11, 4  ;;  %s1437_s8 = scalar_lea.hbm %s1489_s3, %s881_s29  ;;  %s1439_s6 = int_to_ptr.vmem [resolvable:$true] %s768_s6 }
  0x5f   : > { %953 = vmatprep.subr.bf16.mxu1 %v1206_v0  ;;  %s754_s21 = scalar_lea.sflag [#allocation5], %s1383_s19  ;;  %s1114_s25 = scalar_lea.vmem %s1439_s6, 128 }
  0x60   : > { %p1115_p4 = scmp.ne.s32.totalorder %s1439_s6, %s1114_s25  ;;  %s1213_s15 = smov [#allocation8]  }
  0x61   : > { %s1118_s27 = sshll.u32 %s1213_s15, 4  ;;  %s1119_s27 = int_to_ptr.vmem [resolvable:$false] %s1118_s27 }
  0x62   : > { %1044 = vrot.lane.b32.xlu0 %v1043_v9, %s1209_s24  ;;  %955 = vmatpush3.bf16.msra.mxu1 %v954_v10  ;;  %p1116_p6 = pnand %p1115_p4, %p1330_p10  ;;  %s1120_s4 = scalar_lea.vmem %s1119_s27, 256 }
  0x63   : > { %929 = vmatprep.subr.mxu1 %v1208_v1  ;;  %p1121_p12 = scmp.lt.s32.totalorder %s1439_s6, %s1119_s27  ;;  %p1122_p11 = scmp.lt.s32.totalorder %s1120_s4, %s1114_s25 }
  0x64   : > { %p1117_p8 = pneg %p1116_p6 }
  0x65   : > { %922 = vmatmul.mubr.msk.f32.vlgmr.msra.gmra.mrb[0].mxu1 %vm249_vm1, %v219_v11  ;;  %p1123_p0 = por %p1122_p11, %p1121_p12 }
  0x66   : > { %931 = vmatprep.mubr.msk.f32.mxu1 %vm1207_vm0, %v1208_v1 }
  0x67   : > { %p1124_p5 = pnand %p1123_p0, %p1117_p8 }
  0xcf   : > { %v247_v23 = vpop.permute.xlu1 %246 }
  0xd0   : > { %v1040_v12 = vpop.permute.xlu0 %1039 }
  0xd1   : > { %v1042_v13 = vunpack.i.h.bf16 %v1040_v12  ;;  %v1041_v14 = vunpack.i.l.bf16 %v1040_v12 }
  0xd3   : > { %v945_v15 = vpack.c.bf16 %v1042_v13, %v1041_v14 }
  0xd4   : > { %v1045_v16 = vpop.permute.xlu0 %1044 }
  0xd5   : > { %v1047_v17 = vunpack.i.h.bf16 %v1045_v16  ;;  %v1046_v18 = vunpack.i.l.bf16 %v1045_v16  ;;  %946 = vmatpush3.bf16.msra.mxu0 %v945_v15 }
  0xd6   : > { %947 = vmatprep.subr.bf16.mxu0 %v1206_v0 }
  0xd7   : > { %v948_v19 = vpack.c.bf16 %v1047_v17, %v1046_v18 }
  0xd9   : > { %949 = vmatpush3.bf16.msra.mxu0 %v948_v19 }
  0xda   : > { %924 = vmatprep.subr.mxu0 %v1208_v1 }
  0xdc   : > { %911 = vmatmul.mubr.msk.f32.vlgmr.msra.gmra.mrb[0].mxu0 %vm249_vm1, %v219_v11 }
  0xdd   : > { %926 = vmatprep.mubr.msk.f32.mxu0 %vm1207_vm0, %v1208_v1 }
 0x138   : > { %v409_v20 = vpop.f32.mrb[0].mxu1 }
 0x139   : > { %v410_v21 = vadd.f32 %v870_v8, %v409_v20  ;;  %v923_v22 = vpop.f32.mrb[1].mxu1 }
 0x13b   : > { %581 = vrot.lane.b32.xlu0 %v410_v21, %s1210_s9 }
 0x1ad   : > { %v582_v29 = vpop.permute.xlu0 %581 }
 0x1af   : > { %v319_v24 = vpop.f32.mrb[0].mxu0 }
 0x1b0   : > { %v320_v25 = vadd.f32 %v319_v24, %v247_v23  ;;  %v912_v26 = vpop.f32.mrb[1].mxu0 }
 0x1b2   : > { %324 = vst.msk [vmem:[#allocation2] sm:$0xff] %vm323_vm2, %v320_v25 }
 0x1b9   : > { %v580_v27 = vld [vmem:[#allocation2] sm:$0xff] }
 0x1ba   : > { %584 = vrot.lane.b32.xlu1 %v580_v27, %s1210_s9  ;;  %925 = vmatpush3.xpose.msk.msra.mxu0 %vm414_vm3, %v580_v27 }
 0x1bb   : > { %934 = vmatprep.subr.mxu0 %v1208_v1 }
 0x1bd   : > { %927 = vmatmul.mubr.msk.f32.vlgmr.msra.gmra.mrb[2].mxu0 %vm414_vm3, %v410_v21 }
 0x1be   : > { %936 = vmatprep.mubr.msk.f32.mxu0 %vm1207_vm0, %v1208_v1 }
 0x22c   : > { %v585_v28 = vpop.permute.xlu1 %584 }
 0x22d   : > { %935 = vmatpush3.xpose.msk.msra.mxu0 %vm414_vm3, %v585_v28 }
 0x230   : > { %937 = vmatmul.mubr.msk.f32.vlgmr.msra.gmra.mrb[4].mxu0 %vm414_vm3, %v582_v29 }
 0x290   : > { %v487_v30 = vpop.f32.mrb[2].mxu0 }
 0x291   : > { %v928_v31 = vpop.f32.mrb[3].mxu0  ;;  %v492_v32 = vsel %vm491_vm4, %v487_v30, -inf }
 0x292   : > { %493 = vmax.xlane.f32.xlu1 %v492_v32 }
 0x303   : > { %v656_v33 = vpop.f32.mrb[4].mxu0 }
 0x304   : > { %v938_v34 = vpop.f32.mrb[5].mxu0  ;;  %v660_v35 = vsel %vm491_vm4, %v656_v33, -inf }
 0x305   : > { %661 = vmax.xlane.f32.xlu0 %v660_v35 }
 0x31f   : > { %v494_v36 = vpop.xlane.xlu1 %493 }
 0x320   : > { %v495_v37 = vsub.f32 %v487_v30, %v494_v36 }
 0x322   : > { %v496_v38 = vmul.f32 1.442695, %v495_v37 }
 0x324   : > { %1048 = vpow2.f32 %v496_v38 }
 0x32e   : > { %v1049_v39 = vpop.eup %1048 }
 0x32f   : > { %v498_v40 = vsel %vm491_vm4, %v1049_v39, 0.0 }
 0x330   : > { %499 = vadd.xlane.f32.xlu0 %v498_v40 }
 0x346   : > { %503 = vrot.lane.b32.xlu0 %v580_v27, %s1209_s24 }
 0x392   : > { %v662_v41 = vpop.xlane.xlu0 %661 }
 0x393   : > { %v663_v42 = vsub.f32 %v656_v33, %v662_v41 }
 0x395   : > { %v664_v43 = vmul.f32 1.442695, %v663_v42 }
 0x397   : > { %1050 = vpow2.f32 %v664_v43 }
 0x3a1   : > { %v1051_v44 = vpop.eup %1050 }
 0x3a2   : > { %v666_v45 = vsel %vm491_vm4, %v1051_v44, 0.0 }
 0x3a3   : > { %667 = vadd.xlane.f32.xlu1 %v666_v45 }
 0x3b4   : > { %671 = vrot.lane.b32.xlu1 %v580_v27, %s1211_s10 }
 0x3bd   : > { %v500_v46 = vpop.xlane.xlu0 %499 }
 0x3be   : > { %1052 = vrcp.f32 %v500_v46 }
 0x3c1   : > { %v504_v47 = vpop.permute.xlu0 %503 }
 0x3c2   : > { %930 = vmatpush3.msra.mxu1 %v504_v47 }
 0x3c3   : > { %939 = vmatprep.subr.mxu1 %v1208_v1 }
 0x3c8   : > { %v1053_v48 = vpop.eup %1052 }
 0x3c9   : > { %v502_v49 = vmul.f32 %v1053_v48, %v1049_v39 }
 0x3cb   : > { %932 = vmatmul.mubr.msk.f32.vlgmr.msra.gmra.mrb[2].mxu1 %vm491_vm4, %v502_v49 }
 0x3cc   : > { %941 = vmatprep.mubr.msk.f32.mxu1 %vm1207_vm0, %v1208_v1 }
 0x430   : > { %v668_v50 = vpop.xlane.xlu1 %667 }
 0x431   : > { %1054 = vrcp.f32 %v668_v50 }
 0x434   : > { %v672_v51 = vpop.permute.xlu1 %671 }
 0x435   : > { %940 = vmatpush3.msra.mxu1 %v672_v51 }
 0x43b   : > { %v1055_v52 = vpop.eup %1054 }
 0x43c   : > { %v670_v53 = vmul.f32 %v1055_v52, %v1051_v44 }
 0x43e   : > { %942 = vmatmul.mubr.msk.f32.vlgmr.msra.gmra.mrb[4].mxu1 %vm491_vm4, %v670_v53 }
 0x49e   : > { %v575_v54 = vpop.f32.mrb[2].mxu1 }
 0x49f   : > { %579 = vst.msk [vmem:[%s214_s11] sm:$0xff] %vm414_vm3, %v575_v54  ;;  %v933_v55 = vpop.f32.mrb[3].mxu1 }
 0x511   : > { %v743_v56 = vpop.f32.mrb[4].mxu1 }
 0x512   : > { %748 = vrot.lane.b32.xlu1 %v743_v56, %s1212_s18  ;;  %v943_v57 = vpop.f32.mrb[5].mxu1 }
 0x584   : > { %v749_v58 = vpop.permute.xlu1 %748 }
 0x585   : > { %752 = vst.msk [vmem:[%s214_s11] sm:$0xff] %vm751_vm5, %v749_v58 }
 0x586   : > { %1127 = shalt.err (!%p1124_p5)
}
 0x587   : > { %s1128_s19 = scalar_lea.hbm %s1437_s8, 128  ;;  %s1132_s24 = scalar_lea.hbm %s1489_s3, 256 }
 0x588   : > { %p1129_p9 = scmp.ne.s32.totalorder %s1437_s8, %s1128_s19  ;;  %p1133_p7 = scmp.lt.u32.totalorder %s1437_s8, %s1489_s3 }
 0x589   : > { %p1134_p3 = scmp.lt.u32.totalorder %s1132_s24, %s1128_s19  ;;  %p1136_p4 = scmp.lt.u32.totalorder %s1128_s19, %s1437_s8 }
 0x58a   : > { %p1130_p1 = pnand %p1129_p9, %p1330_p10 }
 0x58b   : > { %p1135_p13 = por %p1134_p3, %p1133_p7 }
 0x58c   : > { %p1131_p2 = pneg %p1130_p1 }
 0x58d   : > { %p1137_p6 = por %p1136_p4, %p1135_p13 }
 0x58f   : > { %p1138_p8 = pnand %p1137_p6, %p1131_p2 }
 0x591   : > { %1141 = shalt.err (!%p1138_p8)
}
 0x592   : > { %962 = dma.vmem_to_hbm [thread:$0]  (%p1330_p10), %s1439_s6, 128, %s1437_s8, %s754_s21  }
 0x593 PF: > { %s780_s11 = sand.u32 1, %s1180_s12   ;;  %p1507_p12 = scmp.ne.s32.totalorder %s1497_s23, 0 }
 0x594   : > { %p1508_p11 = scmp.ge.s32.totalorder %s1200_s17, 2  ;;  %s781_s18 = scalar_lea.sflag [#allocation5], %s780_s11 }
 0x596   : > { %p973_p0 = pnand %p1508_p11, %p1507_p12 }
 0x598   : > { %1175 = dma.done.wait (!%p973_p0), %s781_s18, 128  }
 0x599   : > { %1177 = vsyncadd (!%p973_p0), %s781_s18, 4294967168  ;;  %s20_s17 = sadd.s32 1, %s1200_s17   ;;  %s1509_s12 = smov %s1184_s13 }
 0x59a   : > { %p17_p5 = scmp.ge.s32.totalorder %s20_s17, 4   ;;  %s1510_s13 = smov %s1188_s14 }
 0x59b   : > { %s1511_s14 = smov %s1339_s5  ;;  %s1512_s15 = smov %s1196_s16 }
 0x59c   : > { %s1513_s16 = smov %s1515_s28  ;;  %19 = sbr.rel (!%p17_p5) target bundleno = 7 (0x7), region = 86 }
 0x5a3   :  { %786 = vsyncpa [#allocation4], 1 }
 0x5a4   :  { %788 = vsyncpa [#allocation4 + $0x1], 1 }
 0x5a5   :  { %789 = vsyncpa [#allocation7], 1 }
 0x5a6   :  { %790 = vsyncpa [#allocation5], 1 }
 0x5a7   :  { %792 = vsyncpa [#allocation5 + $0x1], 1 }

// kernel: tpu_custom_call.1
= control target key start
LH: loop header
LB: loop body
LE: loop exit
PB: predicated region body
PF: predicated region fallthrough
CT: control target
= control target key end

     0   :  { %8 = vsyncpa [#allocation4], 0  ;;  %s1486_s0 = inlined_call_operand.hbm [shape: f32[2,8,32], index: 0, kind: input, shape index: {}]   ;;  %s1487_s1 = inlined_call_operand.hbm [shape: f32[32,96], index: 1, kind: input, shape index: {}]   ;;  %s1488_s2 = inlined_call_operand.vmem [shape: f32[1,96], index: 2, kind: input, shape index: {}]   ;;  %s1489_s3 = inlined_call_operand.hbm [shape: f32[2,8,32], index: 3, kind: output, shape index: {}]  }
   0x1   :  { %10 = vsyncpa [#allocation4 + $0x1], 0 }
   0x2   :  { %11 = vsyncpa [#allocation7], 0 }
   0x3   :  { %12 = vsyncpa [#allocation5], 0 }
   0x4   :  { %14 = vsyncpa [#allocation5 + $0x1], 0  ;;  %s1234_s12 = smov 0   ;;  %s1236_s13 = smov 0  }
   0x5   :  { %s1238_s14 = smov 0   ;;  %s1240_s15 = smov 0  }
   0x6   :  { %s1242_s16 = smov 0   ;;  %s1244_s17 = smov 0  }
   0x7 LB: > { %s859_s18 = sadd.s32 4294967295, %s1200_s17   ;;  %s860_s19 = sadd.s32 4294967294, %s1200_s17   ;;  %s1200_s17 = sphi %s1244_s17, %s20_s17   ;;  %s1196_s16 = sphi %s1242_s16, %s1513_s16   ;;  %s1192_s15 = sphi %s1240_s15, %s1512_s15   ;;  %s1188_s14 = sphi %s1238_s14, %s1511_s14   ;;  %s1184_s13 = sphi %s1236_s13, %s1510_s13   ;;  %s1180_s12 = sphi %s1234_s12, %s1509_s12  }
   0x8   : > { %p52_p0 = scmp.ne.s32.totalorder %s1184_s13, %s1180_s12  ;;  %p1268_p1 = scmp.eq.s32.totalorder %s859_s18, 0 }
   0x9   : > { %p1272_p2 = scmp.eq.s32.totalorder %s859_s18, 1  ;;  %p126_p3 = scmp.eq.s32.totalorder %s860_s19, 1 }
   0xa   : > { %s1494_s20 = scalar_select %p1268_p1, 1, 0 }
   0xb   : > { %s1495_s21 = scalar_select %p1272_p2, 1, 0 }
   0xc   : > { %p1278_p4 = por %p1268_p1, %p52_p0  ;;  %p861_p5 = scmp.ge.s32.totalorder %s1200_s17, 1 }
   0xd   : > { %p1283_p6 = por %p126_p3, %p52_p0  ;;  %p133_p7 = scmp.lt.s32.totalorder %s1200_s17, 3 }
   0xe   : > { %s1496_s22 = scalar_select %p1278_p4, 1, 0 }
   0xf   : > { %s1497_s23 = scalar_select %p1283_p6, 1, 0 }
  0x10   : > { %p1288_p8 = pnand %p861_p5, %p133_p7  ;;  %s1202_s25 = smov [#allocation6]  }
  0x11   : > { %s145_s26 = sshll.u32 %s1202_s25, 4  ;;  %s32_s28 = sadd.s32 1, %s1196_s16  ;;  %s146_s26 = int_to_ptr.vmem [resolvable:$true] %s145_s26 }
  0x12   : > { %s1498_s24 = scalar_select %p1288_p8, 1, 0 }
  0x13   : > { %p964_p9 = pneg %p1288_p8  ;;  %s1056_s4 = scalar_lea.hbm %s1487_s1, 512 }
  0x14   : > { %p1057_p12 = scmp.ne.s32.totalorder %s1487_s1, %s1056_s4  ;;  %p1063_p5 = scmp.lt.u32.totalorder %s1056_s4, %s1487_s1 }
  0x15   : > { %p1297_p11 = pnand %p964_p9, %p1268_p1 }
  0x17   : > { %p1058_p13 = pneg %p1297_p11 }
  0x19   : > { %p1059_p0 = pnand %p1058_p13, %p1057_p12 }
  0x1b   : > { %p1060_p3 = pneg %p1059_p0 }
  0x1d   : > { %p1065_p7 = pnand %p1063_p5, %p1060_p3 }
  0x1f   : > { %1068 = shalt.err (!%p1065_p7)
}
  0x20   : > { %s1069_s9 = scalar_lea.vmem %s146_s26, 512  ;;  %p1077_p1 = scmp.lt.s32.totalorder %s146_s26, %s146_s26 }
  0x21   : > { %p1070_p9 = scmp.ne.s32.totalorder %s146_s26, %s1069_s9  ;;  %p1078_p4 = scmp.lt.s32.totalorder %s1069_s9, %s1069_s9 }
  0x23   : > { %p1072_p10 = pnand %p1070_p9, %p1058_p13  ;;  %p1079_p8 = por %p1078_p4, %p1077_p1 }
  0x25   : > { %p1073_p6 = pneg %p1072_p10 }
  0x27   : > { %p1080_p2 = pnand %p1079_p8, %p1073_p6 }
  0x29   : > { %1083 = shalt.err (!%p1080_p2)
}
  0x2a   : > { %s1203_s10 = smov 128   ;;  %s1204_s11 = smov 8  }
  0x2b   : > { %967 = dma.hbm_to_vmem [thread:$0]  (!%p1297_p11), %s1487_s1, 512, %s146_s26, [#allocation7], %s1203_s10, %s1203_s10, %s1204_s11  }
  0x2c   : > { %p34_p1 = scmp.ge.s32.totalorder %s32_s28, 2  ;;  %s39_s25 = sadd.s32 1, %s1188_s14 }
  0x2d   : > { %p46_p2 = scmp.ne.s32.totalorder %s1188_s14, %s1184_s13  ;;  %p47_p4 = scmp.eq.s32.totalorder %s1200_s17, 0 }
  0x2e   : > { %s1515_s28 = smov (%p34_p1, %s32_s28), 0  ;;  %p1501_p8 = scmp.ne.s32.totalorder %s1495_s21, 0 }
  0x2f   : > { %p1324_p6 = por %p47_p4, %p46_p2  ;;  %s36_s27 = ssub.s32 %s1196_s16, %s1515_s28 }
  0x30   : > { %p1330_p10 = por %p1501_p8, %p46_p2  ;;  %p977_p12 = scmp.lt.s32.totalorder %s1200_s17, 2 }
  0x31   : > { %p37_p11 = scmp.eq.s32.totalorder %s36_s27, 0  ;;  %s162_s26 = sand.u32 1, %s1188_s14  }
  0x32   : > { %s864_s4 = sshll.u32 %s162_s26, 3  ;;  %s865_s6 = sshll.u32 %s1196_s16, 7 }
  0x33   : > { %s1339_s5 = scalar_select %p37_p11, %s1188_s14, %s39_s25  }
  0x34   : > { %s1345_s9 = scalar_lea.hbm %s1486_s0, %s865_s6  ;;  %s166_s21 = scalar_lea.vmem [#allocation3], %s864_s4 }
  0x35   : > { %s173_s10 = sshll.u32 %s166_s21, 4  ;;  %p1351_p13 = pnand %p977_p12, %p1324_p6  ;;  %s1347_s10 = int_to_ptr.vmem [resolvable:$true] %s173_s10 }
  0x36   : > { %s163_s18 = scalar_lea.sflag [#allocation4], %s162_s26  ;;  %s1084_s19 = scalar_lea.hbm %s1345_s9, 128 }
  0x37   : > { %p1085_p0 = scmp.ne.s32.totalorder %s1345_s9, %s1084_s19  ;;  %p1086_p3 = pneg %p1351_p13 }
  0x38   : > { %s1089_s4 = scalar_lea.hbm %s1486_s0, 256  ;;  %p1090_p9 = scmp.lt.u32.totalorder %s1345_s9, %s1486_s0 }
  0x39   : > { %p1087_p5 = pnand %p1086_p3, %p1085_p0  ;;  %p1091_p1 = scmp.lt.u32.totalorder %s1089_s4, %s1084_s19 }
  0x3a   : > { %p1093_p4 = scmp.lt.u32.totalorder %s1084_s19, %s1345_s9 }
  0x3b   : > { %p1088_p7 = pneg %p1087_p5  ;;  %p1092_p2 = por %p1091_p1, %p1090_p9 }
  0x3d   : > { %p1094_p6 = por %p1093_p4, %p1092_p2 }
  0x3f   : > { %p1095_p8 = pnand %p1094_p6, %p1088_p7 }
  0x41   : > { %1098 = shalt.err (!%p1095_p8)
}
  0x42   : > { %s1099_s26 = scalar_lea.vmem %s1347_s10, 128  ;;  %s1205_s7 = smov [#allocation3]  }
  0x43   : > { %p1100_p12 = scmp.ne.s32.totalorder %s1347_s10, %s1099_s26  ;;  %s1104_s8 = sshll.u32 %s1205_s7, 4  ;;  %s1105_s8 = int_to_ptr.vmem [resolvable:$false] %s1104_s8 }
  0x44   : > { %s1106_s21 = scalar_lea.vmem %s1105_s8, 256  ;;  %p1107_p5 = scmp.lt.s32.totalorder %s1347_s10, %s1105_s8 }
  0x45   : > { %p1102_p11 = pnand %p1100_p12, %p1086_p3  ;;  %p1108_p9 = scmp.lt.s32.totalorder %s1106_s21, %s1099_s26 }
  0x47   : > { %p1103_p0 = pneg %p1102_p11  ;;  %p1109_p1 = por %p1108_p9, %p1107_p5 }
  0x49   : > { %p1110_p2 = pnand %p1109_p1, %p1103_p0 }
  0x4b   : > { %1113 = shalt.err (!%p1110_p2)
}
  0x4c   : > { %971 = dma.hbm_to_vmem [thread:$0]  (!%p1351_p13), %s1345_s9, 128, %s1347_s10, %s163_s18  }
  0x4d   : > { %p1504_p7 = scmp.ne.s32.totalorder %s1498_s24, 0 }
  0x4e   : > { %s1383_s19 = sand.u32 (!%p1504_p7), 1, %s1184_s13   ;;  %p1505_p3 = scmp.ne.s32.totalorder (!%p1504_p7), %s1496_s22, 0 }
  0x4f   : > { %182 = sbr.rel (%p1504_p7) target bundleno = 1427 (0x593), region = 32  ;;  %s867_s25 = sshll.u32 (!%p1504_p7), %s1383_s19, 3 }
  0x50   : > { %s185_s27 = scalar_lea.sflag (!%p1504_p7), [#allocation4], %s1383_s19  ;;  %s188_s4 = scalar_lea.vmem (!%p1504_p7), [#allocation3], %s867_s25 }
  0x56   : > { %1167 = dma.done.wait (%p1505_p3), %s185_s27, 128  }
  0x57   : > { %1169 = vsyncadd (%p1505_p3), %s185_s27, 4294967168  ;;  %p1506_p13 = scmp.ne.s32.totalorder %s1494_s20, 0 }
  0x59   : > { %1171 = dma.done.wait (%p1506_p13), [#allocation7], 512  }
  0x5a   : > { %1173 = vsyncadd (%p1506_p13), [#allocation7], 4294966784  ;;  %v1206_v0 = vmov 0.0|0.0   ;;  %vm1207_vm0 = vmmov 0   ;;  %v1208_v1 = vmov 0.0   ;;  %v220_v2 = vld [vmem:[#allocation6] sm:$0xff] }
  0x5b   : > { %944 = vmatprep.subr.bf16.mxu0 %v1206_v0  ;;  %950 = vmatprep.subr.bf16.mxu1 %v1206_v0  ;;  %v221_v3 = vld [vmem:[#allocation6 + $0x8] sm:$0xff]  ;;  %v222_v4 = vld [vmem:[#allocation6 + $0x10] sm:$0xff]  ;;  %v223_v6 = vld [vmem:[#allocation6 + $0x18] sm:$0xff]  ;;  %s1209_s24 = smov 96   ;;  %vm249_vm1 = vcmask 261120   ;;  %s1210_s9 = smov 112  }
  0x5c   : > { %910 = vmatprep.mubr.msk.f32.mxu0 %vm1207_vm0, %v1208_v1  ;;  %921 = vmatprep.mubr.msk.f32.mxu1 %vm1207_vm0, %v1208_v1  ;;  %v1038_v5 = vpack.i.bf16 %v221_v3, %v220_v2  ;;  %v951_v7 = vpack.c.bf16 %v221_v3, %v220_v2  ;;  %v870_v8 = vld [vmem:[%s1488_s2] ss:$0 sm:$0xff]  ;;  %v1043_v9 = vpack.i.bf16 %v223_v6, %v222_v4  ;;  %v219_v11 = vld [vmem:[%s188_s4] sm:$0xff]  ;;  %vm323_vm2 = vcmask 523264   ;;  %s1211_s10 = smov 80   ;;  %s214_s11 = scalar_lea.vmem [#allocation8], %s867_s25 }
  0x5d   : > { %246 = vrot.lane.b32.xlu1 %v870_v8, %s1209_s24  ;;  %v954_v10 = vpack.c.bf16 %v223_v6, %v222_v4  ;;  %vm414_vm3 = vcmask 130048   ;;  %vm491_vm4 = vcmask 64512   ;;  %s1212_s18 = smov 16   ;;  %s881_s29 = sshll.u32 %s1192_s15, 7  ;;  %vm751_vm5 = vcmask 261248  }
  0x5e   : > { %1039 = vrot.lane.b32.xlu0 %v1038_v5, %s1209_s24  ;;  %952 = vmatpush3.bf16.msra.mxu1 %v951_v7  ;;  %s768_s6 = sshll.u32 %s214_s11, 4  ;;  %s1437_s8 = scalar_lea.hbm %s1489_s3, %s881_s29  ;;  %s1439_s6 = int_to_ptr.vmem [resolvable:$true] %s768_s6 }
  0x5f   : > { %953 = vmatprep.subr.bf16.mxu1 %v1206_v0  ;;  %s754_s21 = scalar_lea.sflag [#allocation5], %s1383_s19  ;;  %s1114_s25 = scalar_lea.vmem %s1439_s6, 128 }
  0x60   : > { %p1115_p4 = scmp.ne.s32.totalorder %s1439_s6, %s1114_s25  ;;  %s1213_s15 = smov [#allocation8]  }
  0x61   : > { %s1118_s27 = sshll.u32 %s1213_s15, 4  ;;  %s1119_s27 = int_to_ptr.vmem [resolvable:$false] %s1118_s27 }
  0x62   : > { %1044 = vrot.lane.b32.xlu0 %v1043_v9, %s1209_s24  ;;  %955 = vmatpush3.bf16.msra.mxu1 %v954_v10  ;;  %p1116_p6 = pnand %p1115_p4, %p1330_p10  ;;  %s1120_s4 = scalar_lea.vmem %s1119_s27, 256 }
  0x63   : > { %929 = vmatprep.subr.mxu1 %v1208_v1  ;;  %p1121_p12 = scmp.lt.s32.totalorder %s1439_s6, %s1119_s27  ;;  %p1122_p11 = scmp.lt.s32.totalorder %s1120_s4, %s1114_s25 }
  0x64   : > { %p1117_p8 = pneg %p1116_p6 }
  0x65   : > { %922 = vmatmul.mubr.msk.f32.vlgmr.msra.gmra.mrb[0].mxu1 %vm249_vm1, %v219_v11  ;;  %p1123_p0 = por %p1122_p11, %p1121_p12 }
  0x66   : > { %931 = vmatprep.mubr.msk.f32.mxu1 %vm1207_vm0, %v1208_v1 }
  0x67   : > { %p1124_p5 = pnand %p1123_p0, %p1117_p8 }
  0xcf   : > { %v247_v23 = vpop.permute.xlu1 %246 }
  0xd0   : > { %v1040_v12 = vpop.permute.xlu0 %1039 }
  0xd1   : > { %v1042_v13 = vunpack.i.h.bf16 %v1040_v12  ;;  %v1041_v14 = vunpack.i.l.bf16 %v1040_v12 }
  0xd3   : > { %v945_v15 = vpack.c.bf16 %v1042_v13, %v1041_v14 }
  0xd4   : > { %v1045_v16 = vpop.permute.xlu0 %1044 }
  0xd5   : > { %v1047_v17 = vunpack.i.h.bf16 %v1045_v16  ;;  %v1046_v18 = vunpack.i.l.bf16 %v1045_v16  ;;  %946 = vmatpush3.bf16.msra.mxu0 %v945_v15 }
  0xd6   : > { %947 = vmatprep.subr.bf16.mxu0 %v1206_v0 }
  0xd7   : > { %v948_v19 = vpack.c.bf16 %v1047_v17, %v1046_v18 }
  0xd9   : > { %949 = vmatpush3.bf16.msra.mxu0 %v948_v19 }
  0xda   : > { %924 = vmatprep.subr.mxu0 %v1208_v1 }
  0xdc   : > { %911 = vmatmul.mubr.msk.f32.vlgmr.msra.gmra.mrb[0].mxu0 %vm249_vm1, %v219_v11 }
  0xdd   : > { %926 = vmatprep.mubr.msk.f32.mxu0 %vm1207_vm0, %v1208_v1 }
 0x138   : > { %v409_v20 = vpop.f32.mrb[0].mxu1 }
 0x139   : > { %v410_v21 = vadd.f32 %v870_v8, %v409_v20  ;;  %v923_v22 = vpop.f32.mrb[1].mxu1 }
 0x13b   : > { %581 = vrot.lane.b32.xlu0 %v410_v21, %s1210_s9 }
 0x1ad   : > { %v582_v29 = vpop.permute.xlu0 %581 }
 0x1af   : > { %v319_v24 = vpop.f32.mrb[0].mxu0 }
 0x1b0   : > { %v320_v25 = vadd.f32 %v319_v24, %v247_v23  ;;  %v912_v26 = vpop.f32.mrb[1].mxu0 }
 0x1b2   : > { %324 = vst.msk [vmem:[#allocation2] sm:$0xff] %vm323_vm2, %v320_v25 }
 0x1b9   : > { %v580_v27 = vld [vmem:[#allocation2] sm:$0xff] }
 0x1ba   : > { %584 = vrot.lane.b32.xlu1 %v580_v27, %s1210_s9  ;;  %925 = vmatpush3.xpose.msk.msra.mxu0 %vm414_vm3, %v580_v27 }
 0x1bb   : > { %934 = vmatprep.subr.mxu0 %v1208_v1 }
 0x1bd   : > { %927 = vmatmul.mubr.msk.f32.vlgmr.msra.gmra.mrb[2].mxu0 %vm414_vm3, %v410_v21 }
 0x1be   : > { %936 = vmatprep.mubr.msk.f32.mxu0 %vm1207_vm0, %v1208_v1 }
 0x22c   : > { %v585_v28 = vpop.permute.xlu1 %584 }
 0x22d   : > { %935 = vmatpush3.xpose.msk.msra.mxu0 %vm414_vm3, %v585_v28 }
 0x230   : > { %937 = vmatmul.mubr.msk.f32.vlgmr.msra.gmra.mrb[4].mxu0 %vm414_vm3, %v582_v29 }
 0x290   : > { %v487_v30 = vpop.f32.mrb[2].mxu0 }
 0x291   : > { %v928_v31 = vpop.f32.mrb[3].mxu0  ;;  %v492_v32 = vsel %vm491_vm4, %v487_v30, -inf }
 0x292   : > { %493 = vmax.xlane.f32.xlu1 %v492_v32 }
 0x303   : > { %v656_v33 = vpop.f32.mrb[4].mxu0 }
 0x304   : > { %v938_v34 = vpop.f32.mrb[5].mxu0  ;;  %v660_v35 = vsel %vm491_vm4, %v656_v33, -inf }
 0x305   : > { %661 = vmax.xlane.f32.xlu0 %v660_v35 }
 0x31f   : > { %v494_v36 = vpop.xlane.xlu1 %493 }
 0x320   : > { %v495_v37 = vsub.f32 %v487_v30, %v494_v36 }
 0x322   : > { %v496_v38 = vmul.f32 1.442695, %v495_v37 }
 0x324   : > { %1048 = vpow2.f32 %v496_v38 }
 0x32e   : > { %v1049_v39 = vpop.eup %1048 }
 0x32f   : > { %v498_v40 = vsel %vm491_vm4, %v1049_v39, 0.0 }
 0x330   : > { %499 = vadd.xlane.f32.xlu0 %v498_v40 }
 0x346   : > { %503 = vrot.lane.b32.xlu0 %v580_v27, %s1209_s24 }
 0x392   : > { %v662_v41 = vpop.xlane.xlu0 %661 }
 0x393   : > { %v663_v42 = vsub.f32 %v656_v33, %v662_v41 }
 0x395   : > { %v664_v43 = vmul.f32 1.442695, %v663_v42 }
 0x397   : > { %1050 = vpow2.f32 %v664_v43 }
 0x3a1   : > { %v1051_v44 = vpop.eup %1050 }
 0x3a2   : > { %v666_v45 = vsel %vm491_vm4, %v1051_v44, 0.0 }
 0x3a3   : > { %667 = vadd.xlane.f32.xlu1 %v666_v45 }
 0x3b4   : > { %671 = vrot.lane.b32.xlu1 %v580_v27, %s1211_s10 }
 0x3bd   : > { %v500_v46 = vpop.xlane.xlu0 %499 }
 0x3be   : > { %1052 = vrcp.f32 %v500_v46 }
 0x3c1   : > { %v504_v47 = vpop.permute.xlu0 %503 }
 0x3c2   : > { %930 = vmatpush3.msra.mxu1 %v504_v47 }
 0x3c3   : > { %939 = vmatprep.subr.mxu1 %v1208_v1 }
 0x3c8   : > { %v1053_v48 = vpop.eup %1052 }
 0x3c9   : > { %v502_v49 = vmul.f32 %v1053_v48, %v1049_v39 }
 0x3cb   : > { %932 = vmatmul.mubr.msk.f32.vlgmr.msra.gmra.mrb[2].mxu1 %vm491_vm4, %v502_v49 }
 0x3cc   : > { %941 = vmatprep.mubr.msk.f32.mxu1 %vm1207_vm0, %v1208_v1 }
 0x430   : > { %v668_v50 = vpop.xlane.xlu1 %667 }
 0x431   : > { %1054 = vrcp.f32 %v668_v50 }
 0x434   : > { %v672_v51 = vpop.permute.xlu1 %671 }
 0x435   : > { %940 = vmatpush3.msra.mxu1 %v672_v51 }
 0x43b   : > { %v1055_v52 = vpop.eup %1054 }
 0x43c   : > { %v670_v53 = vmul.f32 %v1055_v52, %v1051_v44 }
 0x43e   : > { %942 = vmatmul.mubr.msk.f32.vlgmr.msra.gmra.mrb[4].mxu1 %vm491_vm4, %v670_v53 }
 0x49e   : > { %v575_v54 = vpop.f32.mrb[2].mxu1 }
 0x49f   : > { %579 = vst.msk [vmem:[%s214_s11] sm:$0xff] %vm414_vm3, %v575_v54  ;;  %v933_v55 = vpop.f32.mrb[3].mxu1 }
 0x511   : > { %v743_v56 = vpop.f32.mrb[4].mxu1 }
 0x512   : > { %748 = vrot.lane.b32.xlu1 %v743_v56, %s1212_s18  ;;  %v943_v57 = vpop.f32.mrb[5].mxu1 }
 0x584   : > { %v749_v58 = vpop.permute.xlu1 %748 }
 0x585   : > { %752 = vst.msk [vmem:[%s214_s11] sm:$0xff] %vm751_vm5, %v749_v58 }
 0x586   : > { %1127 = shalt.err (!%p1124_p5)
}
 0x587   : > { %s1128_s19 = scalar_lea.hbm %s1437_s8, 128  ;;  %s1132_s24 = scalar_lea.hbm %s1489_s3, 256 }
 0x588   : > { %p1129_p9 = scmp.ne.s32.totalorder %s1437_s8, %s1128_s19  ;;  %p1133_p7 = scmp.lt.u32.totalorder %s1437_s8, %s1489_s3 }
 0x589   : > { %p1134_p3 = scmp.lt.u32.totalorder %s1132_s24, %s1128_s19  ;;  %p1136_p4 = scmp.lt.u32.totalorder %s1128_s19, %s1437_s8 }
 0x58a   : > { %p1130_p1 = pnand %p1129_p9, %p1330_p10 }
 0x58b   : > { %p1135_p13 = por %p1134_p3, %p1133_p7 }
 0x58c   : > { %p1131_p2 = pneg %p1130_p1 }
 0x58d   : > { %p1137_p6 = por %p1136_p4, %p1135_p13 }
 0x58f   : > { %p1138_p8 = pnand %p1137_p6, %p1131_p2 }
 0x591   : > { %1141 = shalt.err (!%p1138_p8)
}
 0x592   : > { %962 = dma.vmem_to_hbm [thread:$0]  (%p1330_p10), %s1439_s6, 128, %s1437_s8, %s754_s21  }
 0x593 PF: > { %s780_s11 = sand.u32 1, %s1180_s12   ;;  %p1507_p12 = scmp.ne.s32.totalorder %s1497_s23, 0 }
 0x594   : > { %p1508_p11 = scmp.ge.s32.totalorder %s1200_s17, 2  ;;  %s781_s18 = scalar_lea.sflag [#allocation5], %s780_s11 }
 0x596   : > { %p973_p0 = pnand %p1508_p11, %p1507_p12 }
 0x598   : > { %1175 = dma.done.wait (!%p973_p0), %s781_s18, 128  }
 0x599   : > { %1177 = vsyncadd (!%p973_p0), %s781_s18, 4294967168  ;;  %s20_s17 = sadd.s32 1, %s1200_s17   ;;  %s1509_s12 = smov %s1184_s13 }
 0x59a   : > { %p17_p5 = scmp.ge.s32.totalorder %s20_s17, 4   ;;  %s1510_s13 = smov %s1188_s14 }
 0x59b   : > { %s1511_s14 = smov %s1339_s5  ;;  %s1512_s15 = smov %s1196_s16 }
 0x59c   : > { %s1513_s16 = smov %s1515_s28  ;;  %19 = sbr.rel (!%p17_p5) target bundleno = 7 (0x7), region = 86 }
 0x5a3   :  { %786 = vsyncpa [#allocation4], 1 }
 0x5a4   :  { %788 = vsyncpa [#allocation4 + $0x1], 1 }
 0x5a5   :  { %789 = vsyncpa [#allocation7], 1 }
 0x5a6   :  { %790 = vsyncpa [#allocation5], 1 }
 0x5a7   :  { %792 = vsyncpa [#allocation5 + $0x1], 1 }

</bundles_post_ra>
